<compile_context>
chip_gen: v6e
topology: v6e:2x2x1
jax: 0.10.0
libtpu: 0.0.40
codegen_flags: <defaults>
</compile_context>

<pallas_src>
import jax
import jax.numpy as jnp
from jax.experimental import pallas as pl
from jax.experimental.pallas import tpu as pltpu


def ssc_kernel(w1_ref, w2_ref, emb_ref, out_ref):
    # w1_ref:  (128, D)  weight1, resident in VMEM (constant index map, no re-DMA)
    # w2_ref:  (C, 128)  weight2, resident in VMEM
    # emb_ref: (D, tn)   node tile of embeddings in native (D, N) layout
    # out_ref: (C, tn)   lane-dense tile of scores (pre-transpose)
    w = jnp.dot(w2_ref[...], w1_ref[...],
                preferred_element_type=jnp.float32)          # (C, D), tiny, hidden under DMA
    out_ref[...] = jnp.dot(w, emb_ref[...],
                           preferred_element_type=jnp.float32).astype(out_ref.dtype)


def ssc_forward(embeds1, weight1, weight2, *, tn=16384):
    """Pallas implementation of SSCLayer.forward's matmul head.

    embeds1: (embed_dim, N)    float32 -- output of inter1 (column-major nodes)
    weight1: (128, embed_dim)  float32
    weight2: (num_classes, 128) float32
    returns: (N, num_classes)  float32  == (weight2 @ (weight1 @ embeds1)).T
    """
    D, N = embeds1.shape
    H = weight1.shape[0]          # 128
    C = weight2.shape[0]          # num_classes

    # Node tile: multiple of 128 lanes, capped so the grid has >= 2 steps
    # (keeps both TensorCores busy on v7x; harmless on single-TC v5e/v6e).
    half_rounded = pl.cdiv(pl.cdiv(N, 2), 128) * 128
    tn_eff = max(128, min(tn, half_rounded))
    grid = (pl.cdiv(N, tn_eff),)

    cost = pl.CostEstimate(
        flops=2 * N * D * C + grid[0] * 2 * C * H * D,
        transcendentals=0,
        bytes_accessed=4 * (D * N + C * N + H * D + C * H),
    )

    scores_cn = pl.pallas_call(
        ssc_kernel,
        out_shape=jax.ShapeDtypeStruct((C, N), jnp.float32),
        grid_spec=pltpu.PrefetchScalarGridSpec(
            num_scalar_prefetch=0,
            grid=grid,
            in_specs=[
                # Tiny weights: full-array blocks, constant index maps -> resident.
                pl.BlockSpec((H, D), lambda i: (0, 0)),
                pl.BlockSpec((C, H), lambda i: (0, 0)),
                # Embedding node tile, native (D, N) layout, N in lanes.
                # Ragged tail block handled by Pallas (masked writes, no N-reduction).
                pl.BlockSpec((D, tn_eff), lambda i: (0, i)),
            ],
            out_specs=pl.BlockSpec((C, tn_eff), lambda i: (0, i)),
        ),
        compiler_params=pltpu.CompilerParams(
            dimension_semantics=("parallel",),
        ),
        cost_estimate=cost,
    )(weight1, weight2, embeds1)

    # Restore the documented (N, num_classes) return contract; C is tiny so this is
    # a cheap epilogue (fused under jit with any downstream consumer).
    return scores_cn.T


def xavier_uniform(key, shape):
    # torch.nn.init.xavier_uniform_ on a (out, in) matrix
    fan_out, fan_in = shape
    bound = (6.0 / (fan_in + fan_out)) ** 0.5
    return jax.random.uniform(key, shape, jnp.float32, minval=-bound, maxval=bound)


if __name__ == "__main__":
    # Small, deterministic shapes consistent with the module:
    num_classes = 2          # "2 for binary classification"
    embed_dim = 64           # inter1.embed_dim
    hidden = 128             # fixed by weight1 = (128, embed_dim)
    n_nodes = 300            # batch of nodes (exercises the ragged-tail path)

    key = jax.random.PRNGKey(0)
    k_emb, k_w1, k_w2 = jax.random.split(key, 3)

    # embeds1 stands in for the output of the external inter1 aggregator.
    embeds1 = jax.random.normal(k_emb, (embed_dim, n_nodes), dtype=jnp.float32)
    weight1 = xavier_uniform(k_w1, (hidden, embed_dim))
    weight2 = xavier_uniform(k_w2, (num_classes, hidden))

    fwd = jax.jit(ssc_forward)
    scores_t = fwd(embeds1, weight1, weight2)
    scores_t = jax.block_until_ready(scores_t)

    # Reference: scores = W2 @ (W1 @ E); return scores.t()
    ref = (weight2 @ (weight1 @ embeds1)).T
    assert scores_t.shape == (n_nodes, num_classes)
    assert jnp.allclose(scores_t, ref, atol=2e-4, rtol=2e-4)

    print("KERNEL_OK")
</pallas_src>

<mosaic_0001>
module attributes {stable_mosaic.version = 11 : i64} {
  func.func @ssc_kernel(%arg0: i32, %arg1: memref<128x64xf32, #tpu.memory_space<vmem>>, %arg2: memref<2x128xf32, #tpu.memory_space<vmem>>, %arg3: memref<64x256xf32, #tpu.memory_space<vmem>>, %arg4: memref<2x256xf32, #tpu.memory_space<vmem>>) attributes {dimension_semantics = [#tpu.dimension_semantics<parallel>], iteration_bounds = array<i64: 2>, scalar_prefetch = 0 : i64, scratch_operands = 0 : i64, tpu.core_type = #tpu.core_type<tc>, window_params = [{pipeline_mode = #tpu.pipeline_mode<synchronous>, transform_indices = @transform_0, window_bounds = array<i64: 128, 64>}, {pipeline_mode = #tpu.pipeline_mode<synchronous>, transform_indices = @transform_1, window_bounds = array<i64: 2, 128>}, {transform_indices = @transform_2, window_bounds = array<i64: 64, 256>}, {transform_indices = @transform_3, window_bounds = array<i64: 2, 256>}]} {
    %c0 = arith.constant 0 : index
    %c0_0 = arith.constant 0 : index
    %0 = vector.load %arg2[%c0, %c0_0] : memref<2x128xf32, #tpu.memory_space<vmem>>, vector<2x128xf32>
    %c0_1 = arith.constant 0 : index
    %c0_2 = arith.constant 0 : index
    %1 = vector.load %arg1[%c0_1, %c0_2] : memref<128x64xf32, #tpu.memory_space<vmem>>, vector<128x64xf32>
    %cst = arith.constant dense<0.000000e+00> : vector<2x64xf32>
    %2 = tpu.matmul %0, %1, %cst {dimension_numbers = #tpu.dot_dimension_numbers<[1], [0], [0], [1], [0, 0, 1, 1], [], []>} : vector<2x128xf32>, vector<128x64xf32>, vector<2x64xf32> -> vector<2x64xf32>
    %c0_3 = arith.constant 0 : index
    %c0_4 = arith.constant 0 : index
    %3 = vector.load %arg3[%c0_3, %c0_4] : memref<64x256xf32, #tpu.memory_space<vmem>>, vector<64x256xf32>
    %cst_5 = arith.constant dense<0.000000e+00> : vector<2x256xf32>
    %4 = tpu.matmul %2, %3, %cst_5 {dimension_numbers = #tpu.dot_dimension_numbers<[1], [0], [0], [1], [0, 0, 1, 1], [], []>} : vector<2x64xf32>, vector<64x256xf32>, vector<2x256xf32> -> vector<2x256xf32>
    %c0_6 = arith.constant 0 : index
    %c0_7 = arith.constant 0 : index
    %5 = vector.load %arg4[%c0_6, %c0_7] : memref<2x256xf32, #tpu.memory_space<vmem>>, vector<2x256xf32>
    tpu.vector_store %arg4[%c0_6, %c0_7], %4 {strides = array<i32>} : memref<2x256xf32, #tpu.memory_space<vmem>>, vector<2x256xf32>,
    return
  }
  func.func @transform_0(%arg0: i32) -> (i32, i32) {
    %c0_i32 = arith.constant 0 : i32
    %c0_i32_0 = arith.constant 0 : i32
    %c0_i32_1 = arith.constant 0 : i32
    return %c0_i32, %c0_i32_0 : i32, i32
  }
  func.func @transform_1(%arg0: i32) -> (i32, i32) {
    %c0_i32 = arith.constant 0 : i32
    %c0_i32_0 = arith.constant 0 : i32
    %c0_i32_1 = arith.constant 0 : i32
    return %c0_i32, %c0_i32_0 : i32, i32
  }
  func.func @transform_2(%arg0: i32) -> (i32, i32) {
    %c0_i32 = arith.constant 0 : i32
    %c0_i32_0 = arith.constant 0 : i32
    return %c0_i32, %arg0 : i32, i32
  }
  func.func @transform_3(%arg0: i32) -> (i32, i32) {
    %c0_i32 = arith.constant 0 : i32
    %c0_i32_0 = arith.constant 0 : i32
    return %c0_i32, %arg0 : i32, i32
  }
}

</mosaic_0001>

<bundles_post_ra>
// kernel: ssc_forward.1
= control target key start
LH: loop header
LB: loop body
LE: loop exit
PB: predicated region body
PF: predicated region fallthrough
CT: control target
= control target key end

     0   :  { %8 = vsyncpa [#allocation4], 0  ;;  %s1997_s0 = inlined_call_operand.vmem [shape: f32[128,64], index: 0, kind: input, shape index: {}]   ;;  %s1998_s1 = inlined_call_operand.vmem [shape: f32[2,128], index: 1, kind: input, shape index: {}]   ;;  %s1999_s2 = inlined_call_operand.vmem [shape: f32[64,300], index: 2, kind: input, shape index: {}]   ;;  %s2000_s3 = inlined_call_operand.hbm [shape: f32[2,300], index: 3, kind: output, shape index: {}]  }
   0x1   :  { %10 = vsyncpa [#allocation4 + $0x1], 0  ;;  %s1493_s12 = smov 0   ;;  %s1495_s13 = smov 0  }
   0x2   :  { %s1497_s14 = smov 0   ;;  %s1499_s15 = smov 0  }
   0x3 LB: > { %s1514_s16 = sadd.s32 4294967295, %s1402_s15   ;;  %s1004_s17 = sadd.s32 4294967294, %s1402_s15   ;;  %s1402_s15 = sphi %s1499_s15, %s2018_s15   ;;  %s1398_s14 = sphi %s1497_s14, %s2017_s14   ;;  %s1394_s13 = sphi %s1495_s13, %s2016_s13   ;;  %s1390_s12 = sphi %s1493_s12, %s2015_s12  }
   0x4   : > { %s1518_s18 = sadd.s32 1, %s1402_s15   ;;  %s65_s19 = sadd.s32 1, %s1398_s14 }
   0x5   : > { %s62_s20 = ssub.s32 %s1402_s15, %s1518_s18  ;;  %p72_p0 = scmp.ne.s32.totalorder %s1398_s14, %s1394_s13 }
   0x6   : > { %p63_p1 = scmp.eq.s32.totalorder %s62_s20, 0  ;;  %p73_p2 = scmp.eq.s32.totalorder %s1402_s15, 0 }
   0x7   : > { %p102_p3 = scmp.eq.s32.totalorder %s1514_s16, 1  ;;  %p107_p4 = scmp.ne.s32.totalorder %s1394_s13, %s1390_s12 }
   0x8   : > { %s1530_s21 = scalar_select %p63_p1, %s1398_s14, %s65_s19  }
   0x9   : > { %p74_p5 = por %p73_p2, %p72_p0  ;;  %p1532_p6 = por %p102_p3, %p72_p0 }
   0xa   : > { %p108_p7 = scmp.eq.s32.totalorder %s1004_s17, 1  ;;  %p1006_p9 = scmp.ge.s32.totalorder %s1402_s15, 2 }
   0xc   : > { %p1536_p8 = por %p108_p7, %p107_p4  ;;  %130 = sbr.rel (%p1006_p9) target bundleno = 140 (0x8c), region = 24 }
  0x11   : > { %133 = sbr.rel (!%p74_p5) target bundleno = 140 (0x8c), region = 28  ;;  %s135_s24 = sand.u32 (%p74_p5), 1, %s1398_s14  }
  0x12   : > { %s1008_s25 = sshll.u32 (%p74_p5), %s1402_s15, 1  ;;  %s1007_s26 = sshll.u32 (%p74_p5), %s135_s24, 7 }
  0x13   : > { %s139_s27 = ssub.s32 (%p74_p5), 3, %s1008_s25  ;;  %s1050_s28 = sshll.u32 (%p74_p5), %s1402_s15, 4 }
  0x14   : > { %p140_p10 = scmp.lt.s32.totalorder (%p74_p5), %s139_s27, 2  ;;  %s1549_s4 = scalar_lea.vmem (%p74_p5), %s1999_s2, %s1050_s28  }
  0x15   : > { %s1553_s7 = scalar_lea.vmem (%p74_p5), [#allocation2], %s1007_s26  }
  0x16   : > { %s2020_s27 = smov (!%p140_p10, %s139_s27), 2 }
  0x17   : > { %s1009_s5 = sshll.u32 %s2020_s27, 10  ;;  %s1551_s6 = sshll.u32 %s2020_s27, 3 }
  0x18   : > { %p1013_p11 = scmp.eq.s32.totalorder %s1009_s5, 0 }
  0x19   : > { %p150_p12 = scmp.lt.u32.totalorder (!%p1013_p11), %s1551_s6, 8 }
  0x1a   : > { %149 = sbr.rel (%p1013_p11) target bundleno = 140 (0x8c), region = 32 }
  0x1f   : > { %153 = sbr.rel (%p150_p12) target bundleno = 125 (0x7d), region = 36  ;;  %s1557_s8 = sand.u32 (!%p150_p12), 7, %s1551_s6  }
  0x20   : > { %p184_p13 = scmp.eq.s32.totalorder (!%p150_p12), %s1557_s8, 0  ;;  %p1014_p0 = scmp.ne.s32.totalorder (!%p150_p12), %s1557_s8, 0 }
  0x24   : > { %187 = sbr.rel (%p1014_p0) target bundleno = 75 (0x4b), region = 51  ;;  %s188_s9 = sshrl.u32 (!%p1014_p0), %s1551_s6, 3 }
  0x25   : > { %s1564_s10 = sshrl.u32 (!%p1014_p0), %s188_s9, 3 }
  0x26   : > { %p1015_p1 = scmp.le.s32.totalorder (!%p1014_p0), %s1564_s10, 0 }
  0x29   : > { %932 = sbr.rel (%p1015_p1) target bundleno = 59 (0x3b), region = 150  ;;  %s2003_s11 = smov (!%p1015_p1), %s1553_s7 }
  0x2a   : > { %s2004_s17 = smov (!%p1015_p1), %s1549_s4  ;;  %s1573_s19 = smov (!%p1015_p1), 0  }
  0x2b   : > { %s1575_s20 = smov (!%p1015_p1), 0  }
  0x2e LB: >> { %v293_v0 = vld [vmem:[%s1410_s17 + $0xa8] sm:$0xff]  ;;  %v295_v1 = vld [vmem:[%s1410_s17 + $0xb0] sm:$0xff]  ;;  %v207_v2 = vld [vmem:[%s1410_s17 + $0x18] sm:$0xff]  ;;  %s329_s24 = sadd.s32 1, %s1414_s19  ;;  %s195_s20 = sadd.s32 1, %s1418_s20   ;;  %s1418_s20 = sphi %s1575_s20, %s195_s20   ;;  %s1414_s19 = sphi %s1573_s19, %s2005_s19   ;;  %s1410_s17 = sphi %s2004_s17, %s334_s17   ;;  %s1406_s11 = sphi %s2003_s11, %s335_s11  }
  0x2f   : >> { %v223_v3 = vld [vmem:[%s1410_s17 + $0x30] sm:$0xff]  ;;  %v239_v4 = vld [vmem:[%s1410_s17 + $0x48] sm:$0xff]  ;;  %v255_v5 = vld [vmem:[%s1410_s17 + $0x60] sm:$0xff]  ;;  %218 = vst [vmem:[%s1406_s11 + $0x10] sm:$0xff] %v207_v2  ;;  %p330_p2 = scmp.ge.s32.totalorder %s329_s24, %s1564_s10  ;;  %p194_p3 = scmp.ge.s32.totalorder %s195_s20, %s1564_s10 }
  0x30   : >> { %314 = vst [vmem:[%s1406_s11 + $0x70] sm:$0xff] %v293_v0  ;;  %316 = vst [vmem:[%s1406_s11 + $0x78] sm:$0xff] %v295_v1  ;;  %v271_v6 = vld [vmem:[%s1410_s17 + $0x78] sm:$0xff]  ;;  %v287_v7 = vld [vmem:[%s1410_s17 + $0x90] sm:$0xff] }
  0x31   : >> { %v307_v8 = vld [vmem:[%s1410_s17 + $0xb8] sm:$0xff]  ;;  %234 = vst [vmem:[%s1406_s11 + $0x20] sm:$0xff] %v223_v3  ;;  %250 = vst [vmem:[%s1406_s11 + $0x30] sm:$0xff] %v239_v4  ;;  %v309_v9 = vld [vmem:[%s1410_s17 + $0xc0] sm:$0xff]  ;;  %s2022_s24 = smov (%p330_p2, %s329_s24), 0 }
  0x32   : >> { %266 = vst [vmem:[%s1406_s11 + $0x40] sm:$0xff] %v255_v5  ;;  %v311_v10 = vld [vmem:[%s1410_s17 + $0xc8] sm:$0xff]  ;;  %v201_v11 = vld [vmem:[%s1410_s17] sm:$0xff]  ;;  %282 = vst [vmem:[%s1406_s11 + $0x50] sm:$0xff] %v271_v6  ;;  %s1016_s25 = sshll.u32 %s2022_s24, 6  ;;  %s2005_s19 = smov %s2022_s24 }
  0x33   : >> { %298 = vst [vmem:[%s1406_s11 + $0x60] sm:$0xff] %v287_v7  ;;  %318 = vst [vmem:[%s1406_s11 + $0x80] sm:$0xff] %v307_v8  ;;  %v203_v12 = vld [vmem:[%s1410_s17 + $0x8] sm:$0xff]  ;;  %v219_v13 = vld [vmem:[%s1410_s17 + $0x20] sm:$0xff] }
  0x34   : >> { %202 = vst [vmem:[%s1406_s11] sm:$0xff] %v201_v11  ;;  %v235_v14 = vld [vmem:[%s1410_s17 + $0x38] sm:$0xff]  ;;  %320 = vst [vmem:[%s1406_s11 + $0x88] sm:$0xff] %v309_v9  ;;  %v251_v15 = vld [vmem:[%s1410_s17 + $0x50] sm:$0xff] }
  0x35   : >> { %322 = vst [vmem:[%s1406_s11 + $0x90] sm:$0xff] %v311_v10  ;;  %204 = vst [vmem:[%s1406_s11 + $0x8] sm:$0xff] %v203_v12  ;;  %v267_v16 = vld [vmem:[%s1410_s17 + $0x68] sm:$0xff]  ;;  %v283_v17 = vld [vmem:[%s1410_s17 + $0x80] sm:$0xff] }
  0x36   : >> { %220 = vst [vmem:[%s1406_s11 + $0x18] sm:$0xff] %v219_v13  ;;  %236 = vst [vmem:[%s1406_s11 + $0x28] sm:$0xff] %v235_v14  ;;  %v299_v18 = vld [vmem:[%s1410_s17 + $0x98] sm:$0xff]  ;;  %v323_v19 = vld [vmem:[%s1410_s17 + $0xd0] sm:$0xff]  ;;  %197 = sbr.rel (!%p194_p3) target bundleno = 46 (0x2e), region = 156 }
  0x37   : >> { %252 = vst [vmem:[%s1406_s11 + $0x38] sm:$0xff] %v251_v15  ;;  %268 = vst [vmem:[%s1406_s11 + $0x48] sm:$0xff] %v267_v16  ;;  %v325_v20 = vld [vmem:[%s1410_s17 + $0xd8] sm:$0xff]  ;;  %v327_v21 = vld [vmem:[%s1410_s17 + $0xe0] sm:$0xff]  ;;  %s334_s17 = scalar_lea.vmem %s1549_s4, %s1016_s25  }
  0x38   : >> { %284 = vst [vmem:[%s1406_s11 + $0x58] sm:$0xff] %v283_v17  ;;  %300 = vst [vmem:[%s1406_s11 + $0x68] sm:$0xff] %v299_v18 }
  0x39   : >> { %324 = vst [vmem:[%s1406_s11 + $0x98] sm:$0xff] %v323_v19  ;;  %326 = vst [vmem:[%s1406_s11 + $0xa0] sm:$0xff] %v325_v20 }
  0x3a   : >> { %328 = vst [vmem:[%s1406_s11 + $0xa8] sm:$0xff] %v327_v21  ;;  %s335_s11 = scalar_lea.vmem %s1553_s7, %s1016_s25 [#allocation2]  }
  0x3b PF: > { %s1649_s26 = sand.u32 7, %s188_s9   ;;  %s1051_s27 = sshll.u32 %s1564_s10, 10 }
  0x3c   : > { %s340_s28 = sshra.s32 %s1051_s27, 4  ;;  %p1021_p4 = scmp.le.s32.totalorder %s1649_s26, 0 }
  0x3d   : > { %s1653_s29 = scalar_lea.vmem %s1549_s4, %s340_s28   ;;  %s1656_s30 = scalar_lea.vmem %s1553_s7, %s340_s28 [#allocation2]  }
  0x3e   : > { %946 = sbr.rel (%p1021_p4) target bundleno = 75 (0x4b), region = 161  ;;  %s2006_s5 = smov (!%p1021_p4), %s1656_s30 }
  0x3f   : > { %s2007_s11 = smov (!%p1021_p4), %s1653_s29  ;;  %s1665_s17 = smov (!%p1021_p4), 0  }
  0x40   : > { %s1667_s19 = smov (!%p1021_p4), 0  }
  0x43 LB: >> { %v356_v22 = vld [vmem:[%s1426_s11] sm:$0xff]  ;;  %v358_v23 = vld [vmem:[%s1426_s11 + $0x18] sm:$0xff]  ;;  %v360_v24 = vld [vmem:[%s1426_s11 + $0x30] sm:$0xff]  ;;  %s372_s9 = sadd.s32 1, %s1430_s17  ;;  %s350_s19 = sadd.s32 1, %s1434_s19   ;;  %s1434_s19 = sphi %s1667_s19, %s350_s19   ;;  %s1430_s17 = sphi %s1665_s17, %s2008_s17   ;;  %s1426_s11 = sphi %s2007_s11, %s377_s11   ;;  %s1422_s5 = sphi %s2006_s5, %s378_s5  }
  0x44   : >> { %357 = vst [vmem:[%s1422_s5] sm:$0xff] %v356_v22  ;;  %359 = vst [vmem:[%s1422_s5 + $0x10] sm:$0xff] %v358_v23  ;;  %v362_v25 = vld [vmem:[%s1426_s11 + $0x48] sm:$0xff]  ;;  %v364_v26 = vld [vmem:[%s1426_s11 + $0x60] sm:$0xff]  ;;  %p373_p5 = scmp.ge.s32.totalorder %s372_s9, %s1649_s26  ;;  %p349_p7 = scmp.ge.s32.totalorder %s350_s19, %s1649_s26 }
  0x45   : >> { %361 = vst [vmem:[%s1422_s5 + $0x20] sm:$0xff] %v360_v24  ;;  %v366_v27 = vld [vmem:[%s1426_s11 + $0x78] sm:$0xff]  ;;  %363 = vst [vmem:[%s1422_s5 + $0x30] sm:$0xff] %v362_v25  ;;  %v368_v28 = vld [vmem:[%s1426_s11 + $0x90] sm:$0xff] }
  0x46   : >> { %365 = vst [vmem:[%s1422_s5 + $0x40] sm:$0xff] %v364_v26  ;;  %367 = vst [vmem:[%s1422_s5 + $0x50] sm:$0xff] %v366_v27  ;;  %v370_v29 = vld [vmem:[%s1426_s11 + $0xa8] sm:$0xff]  ;;  %s2024_s9 = smov (%p373_p5, %s372_s9), 0  ;;  %352 = sbr.rel (!%p349_p7) target bundleno = 67 (0x43), region = 167 }
  0x47   : >> { %369 = vst [vmem:[%s1422_s5 + $0x60] sm:$0xff] %v368_v28  ;;  %371 = vst [vmem:[%s1422_s5 + $0x70] sm:$0xff] %v370_v29  ;;  %s1022_s10 = sshll.u32 %s2024_s9, 3  ;;  %s2008_s17 = smov %s2024_s9 }
  0x48   : >> { %s377_s11 = scalar_lea.vmem %s1653_s29, %s1022_s10   ;;  %s378_s5 = scalar_lea.vmem %s1656_s30, %s1022_s10 [#allocation2]  }
  0x4b PF: > { %381 = sbr.rel (%p184_p13) target bundleno = 125 (0x7d), region = 69  ;;  %s383_s20 = ssub.s32 (!%p184_p13), %s1551_s6, %s1557_s8 }
  0x4c   : > { %s387_s24 = sshrl.u32 (!%p184_p13), %s1551_s6, 3  ;;  %s1691_s25 = scalar_lea.vmem (!%p184_p13), %s1549_s4, %s383_s20 }
  0x4d   : > { %s1694_s27 = scalar_lea.vmem (!%p184_p13), %s1553_s7, %s383_s20 [#allocation2]  ;;  %s1698_s28 = sshrl.u32 (!%p184_p13), %s387_s24, 3 }
  0x4e   : > { %p1024_p10 = scmp.le.s32.totalorder (!%p184_p13), %s1698_s28, 0 }
  0x50   : > { %960 = sbr.rel (%p1024_p10) target bundleno = 98 (0x62), region = 172  ;;  %s2009_s26 = smov (!%p1024_p10), %s1553_s7 }
  0x51   : > { %s2010_s29 = smov (!%p1024_p10), %s1549_s4  ;;  %s1707_s30 = smov (!%p1024_p10), 0  }
  0x52   : > { %s1709_s5 = smov (!%p1024_p10), 0  }
  0x55 LB: >> { %v492_v30 = vld [vmem:[%s1442_s29 + $0xa8] sm:$0xff]  ;;  %v494_v31 = vld [vmem:[%s1442_s29 + $0xb0] sm:$0xff]  ;;  %v406_v32 = vld [vmem:[%s1442_s29 + $0x18] sm:$0xff]  ;;  %s528_s11 = sadd.s32 1, %s1446_s30  ;;  %s394_s5 = sadd.s32 1, %s1450_s5   ;;  %s1450_s5 = sphi %s1709_s5, %s394_s5   ;;  %s1446_s30 = sphi %s1707_s30, %s2011_s30   ;;  %s1442_s29 = sphi %s2010_s29, %s533_s29   ;;  %s1438_s26 = sphi %s2009_s26, %s534_s26  }
  0x56   : >> { %v422_v33 = vld [vmem:[%s1442_s29 + $0x30] sm:$0xff]  ;;  %v438_v34 = vld [vmem:[%s1442_s29 + $0x48] sm:$0xff]  ;;  %v454_v35 = vld [vmem:[%s1442_s29 + $0x60] sm:$0xff]  ;;  %417 = vst [vmem:[%s1438_s26 + $0x10] sm:$0xff] %v406_v32  ;;  %p529_p11 = scmp.ge.s32.totalorder %s528_s11, %s1698_s28  ;;  %p393_p12 = scmp.ge.s32.totalorder %s394_s5, %s1698_s28 }
  0x57   : >> { %513 = vst [vmem:[%s1438_s26 + $0x70] sm:$0xff] %v492_v30  ;;  %515 = vst [vmem:[%s1438_s26 + $0x78] sm:$0xff] %v494_v31  ;;  %v470_v36 = vld [vmem:[%s1442_s29 + $0x78] sm:$0xff]  ;;  %v486_v37 = vld [vmem:[%s1442_s29 + $0x90] sm:$0xff] }
  0x58   : >> { %v506_v38 = vld [vmem:[%s1442_s29 + $0xb8] sm:$0xff]  ;;  %433 = vst [vmem:[%s1438_s26 + $0x20] sm:$0xff] %v422_v33  ;;  %449 = vst [vmem:[%s1438_s26 + $0x30] sm:$0xff] %v438_v34  ;;  %v508_v39 = vld [vmem:[%s1442_s29 + $0xc0] sm:$0xff]  ;;  %s2026_s11 = smov (%p529_p11, %s528_s11), 0 }
  0x59   : >> { %465 = vst [vmem:[%s1438_s26 + $0x40] sm:$0xff] %v454_v35  ;;  %v510_v40 = vld [vmem:[%s1442_s29 + $0xc8] sm:$0xff]  ;;  %v400_v41 = vld [vmem:[%s1442_s29] sm:$0xff]  ;;  %481 = vst [vmem:[%s1438_s26 + $0x50] sm:$0xff] %v470_v36  ;;  %s1025_s17 = sshll.u32 %s2026_s11, 6  ;;  %s2011_s30 = smov %s2026_s11 }
  0x5a   : >> { %497 = vst [vmem:[%s1438_s26 + $0x60] sm:$0xff] %v486_v37  ;;  %517 = vst [vmem:[%s1438_s26 + $0x80] sm:$0xff] %v506_v38  ;;  %v402_v42 = vld [vmem:[%s1442_s29 + $0x8] sm:$0xff]  ;;  %v418_v43 = vld [vmem:[%s1442_s29 + $0x20] sm:$0xff] }
  0x5b   : >> { %401 = vst [vmem:[%s1438_s26] sm:$0xff] %v400_v41  ;;  %v434_v44 = vld [vmem:[%s1442_s29 + $0x38] sm:$0xff]  ;;  %519 = vst [vmem:[%s1438_s26 + $0x88] sm:$0xff] %v508_v39  ;;  %v450_v45 = vld [vmem:[%s1442_s29 + $0x50] sm:$0xff] }
  0x5c   : >> { %521 = vst [vmem:[%s1438_s26 + $0x90] sm:$0xff] %v510_v40  ;;  %403 = vst [vmem:[%s1438_s26 + $0x8] sm:$0xff] %v402_v42  ;;  %v466_v46 = vld [vmem:[%s1442_s29 + $0x68] sm:$0xff]  ;;  %v482_v47 = vld [vmem:[%s1442_s29 + $0x80] sm:$0xff] }
  0x5d   : >> { %419 = vst [vmem:[%s1438_s26 + $0x18] sm:$0xff] %v418_v43  ;;  %435 = vst [vmem:[%s1438_s26 + $0x28] sm:$0xff] %v434_v44  ;;  %v498_v48 = vld [vmem:[%s1442_s29 + $0x98] sm:$0xff]  ;;  %v522_v49 = vld [vmem:[%s1442_s29 + $0xd0] sm:$0xff]  ;;  %396 = sbr.rel (!%p393_p12) target bundleno = 85 (0x55), region = 178 }
  0x5e   : >> { %451 = vst [vmem:[%s1438_s26 + $0x38] sm:$0xff] %v450_v45  ;;  %467 = vst [vmem:[%s1438_s26 + $0x48] sm:$0xff] %v466_v46  ;;  %v524_v50 = vld [vmem:[%s1442_s29 + $0xd8] sm:$0xff]  ;;  %v526_v51 = vld [vmem:[%s1442_s29 + $0xe0] sm:$0xff]  ;;  %s533_s29 = scalar_lea.vmem %s1549_s4, %s1025_s17  }
  0x5f   : >> { %483 = vst [vmem:[%s1438_s26 + $0x58] sm:$0xff] %v482_v47  ;;  %499 = vst [vmem:[%s1438_s26 + $0x68] sm:$0xff] %v498_v48 }
  0x60   : >> { %523 = vst [vmem:[%s1438_s26 + $0x98] sm:$0xff] %v522_v49  ;;  %525 = vst [vmem:[%s1438_s26 + $0xa0] sm:$0xff] %v524_v50 }
  0x61   : >> { %527 = vst [vmem:[%s1438_s26 + $0xa8] sm:$0xff] %v526_v51  ;;  %s534_s26 = scalar_lea.vmem %s1553_s7, %s1025_s17 [#allocation2]  }
  0x62 PF: > { %s1783_s19 = sand.u32 7, %s387_s24   ;;  %s1053_s9 = sshll.u32 %s1698_s28, 10 }
  0x63   : > { %s539_s10 = sshra.s32 %s1053_s9, 4  ;;  %p1030_p13 = scmp.le.s32.totalorder %s1783_s19, 0 }
  0x64   : > { %s1787_s20 = scalar_lea.vmem %s1549_s4, %s539_s10   ;;  %s1790_s17 = scalar_lea.vmem %s1553_s7, %s539_s10 [#allocation2]  }
  0x65   : > { %974 = sbr.rel (%p1030_p13) target bundleno = 114 (0x72), region = 183  ;;  %s2012_s26 = smov (!%p1030_p13), %s1790_s17 }
  0x66   : > { %s2013_s29 = smov (!%p1030_p13), %s1787_s20  ;;  %s1799_s30 = smov (!%p1030_p13), 0  }
  0x67   : > { %s1801_s5 = smov (!%p1030_p13), 0  }
  0x6a LB: >> { %v555_v52 = vld [vmem:[%s1458_s29] sm:$0xff]  ;;  %v557_v53 = vld [vmem:[%s1458_s29 + $0x18] sm:$0xff]  ;;  %v559_v54 = vld [vmem:[%s1458_s29 + $0x30] sm:$0xff]  ;;  %s571_s24 = sadd.s32 1, %s1462_s30  ;;  %s549_s5 = sadd.s32 1, %s1466_s5   ;;  %s1466_s5 = sphi %s1801_s5, %s549_s5   ;;  %s1462_s30 = sphi %s1799_s30, %s2014_s30   ;;  %s1458_s29 = sphi %s2013_s29, %s576_s29   ;;  %s1454_s26 = sphi %s2012_s26, %s577_s26  }
  0x6b   : >> { %556 = vst [vmem:[%s1454_s26] sm:$0xff] %v555_v52  ;;  %558 = vst [vmem:[%s1454_s26 + $0x10] sm:$0xff] %v557_v53  ;;  %v561_v55 = vld [vmem:[%s1458_s29 + $0x48] sm:$0xff]  ;;  %v563_v56 = vld [vmem:[%s1458_s29 + $0x60] sm:$0xff]  ;;  %p572_p0 = scmp.ge.s32.totalorder %s571_s24, %s1783_s19  ;;  %p548_p1 = scmp.ge.s32.totalorder %s549_s5, %s1783_s19 }
  0x6c   : >> { %560 = vst [vmem:[%s1454_s26 + $0x20] sm:$0xff] %v559_v54  ;;  %v565_v57 = vld [vmem:[%s1458_s29 + $0x78] sm:$0xff]  ;;  %562 = vst [vmem:[%s1454_s26 + $0x30] sm:$0xff] %v561_v55  ;;  %v567_v58 = vld [vmem:[%s1458_s29 + $0x90] sm:$0xff] }
  0x6d   : >> { %564 = vst [vmem:[%s1454_s26 + $0x40] sm:$0xff] %v563_v56  ;;  %566 = vst [vmem:[%s1454_s26 + $0x50] sm:$0xff] %v565_v57  ;;  %v569_v59 = vld [vmem:[%s1458_s29 + $0xa8] sm:$0xff]  ;;  %s2028_s24 = smov (%p572_p0, %s571_s24), 0  ;;  %551 = sbr.rel (!%p548_p1) target bundleno = 106 (0x6a), region = 189 }
  0x6e   : >> { %568 = vst [vmem:[%s1454_s26 + $0x60] sm:$0xff] %v567_v58  ;;  %570 = vst [vmem:[%s1454_s26 + $0x70] sm:$0xff] %v569_v59  ;;  %s1031_s28 = sshll.u32 %s2028_s24, 3  ;;  %s2014_s30 = smov %s2028_s24 }
  0x6f   : >> { %s576_s29 = scalar_lea.vmem %s1787_s20, %s1031_s28   ;;  %s577_s26 = scalar_lea.vmem %s1790_s17, %s1031_s28 [#allocation2]  }
  0x72 PF: > { %s1468_s11 = smov 1  }
  0x73   : > { %s578_s9 = sshll.u32 %s1468_s11, %s1557_s8 }
  0x74   : > { %s1033_s10 = sadd.s32 4294967295, %s578_s9 }
  0x75   : > { %v588_v60 = vld [vmem:[%s1691_s25] sm:%s1033_s10]  ;;  %v590_v61 = vld [vmem:[%s1691_s25 + $0x18] sm:%s1033_s10] }
  0x76   : > { %589 = vst [vmem:[%s1694_s27] sm:%s1033_s10] %v588_v60  ;;  %591 = vst [vmem:[%s1694_s27 + $0x10] sm:%s1033_s10] %v590_v61 }
  0x77   : > { %v592_v62 = vld [vmem:[%s1691_s25 + $0x30] sm:%s1033_s10]  ;;  %v594_v63 = vld [vmem:[%s1691_s25 + $0x48] sm:%s1033_s10] }
  0x78   : > { %593 = vst [vmem:[%s1694_s27 + $0x20] sm:%s1033_s10] %v592_v62  ;;  %595 = vst [vmem:[%s1694_s27 + $0x30] sm:%s1033_s10] %v594_v63 }
  0x79   : > { %v596_v0 = vld [vmem:[%s1691_s25 + $0x60] sm:%s1033_s10]  ;;  %v598_v1 = vld [vmem:[%s1691_s25 + $0x78] sm:%s1033_s10] }
  0x7a   : > { %597 = vst [vmem:[%s1694_s27 + $0x40] sm:%s1033_s10] %v596_v0  ;;  %599 = vst [vmem:[%s1694_s27 + $0x50] sm:%s1033_s10] %v598_v1 }
  0x7b   : > { %v600_v2 = vld [vmem:[%s1691_s25 + $0x90] sm:%s1033_s10]  ;;  %v602_v3 = vld [vmem:[%s1691_s25 + $0xa8] sm:%s1033_s10] }
  0x7c   : > { %601 = vst [vmem:[%s1694_s27 + $0x60] sm:%s1033_s10] %v600_v2  ;;  %603 = vst [vmem:[%s1694_s27 + $0x70] sm:%s1033_s10] %v602_v3 }
  0x7d PF: > { %p1034_p2 = scmp.ge.u32.totalorder %s1551_s6, 8 }
  0x7e   : > { %s1469_s8 = smov (!%p1034_p2), 1  }
  0x7f   : > { %156 = sbr.rel (%p1034_p2) target bundleno = 140 (0x8c), region = 40  ;;  %s157_s25 = sshll.u32 (!%p1034_p2), %s1469_s8, %s1551_s6 }
  0x80   : > { %s1035_s27 = sadd.s32 (!%p1034_p2), 4294967295, %s157_s25 }
  0x84   : > { %v167_v4 = vld [vmem:[%s1549_s4] sm:%s1035_s27]  ;;  %v169_v5 = vld [vmem:[%s1549_s4 + $0x18] sm:%s1035_s27] }
  0x85   : > { %168 = vst [vmem:[%s1553_s7] sm:%s1035_s27] %v167_v4  ;;  %170 = vst [vmem:[%s1553_s7 + $0x10] sm:%s1035_s27] %v169_v5 }
  0x86   : > { %v171_v6 = vld [vmem:[%s1549_s4 + $0x30] sm:%s1035_s27]  ;;  %v173_v7 = vld [vmem:[%s1549_s4 + $0x48] sm:%s1035_s27] }
  0x87   : > { %172 = vst [vmem:[%s1553_s7 + $0x20] sm:%s1035_s27] %v171_v6  ;;  %174 = vst [vmem:[%s1553_s7 + $0x30] sm:%s1035_s27] %v173_v7 }
  0x88   : > { %v175_v8 = vld [vmem:[%s1549_s4 + $0x60] sm:%s1035_s27]  ;;  %v177_v9 = vld [vmem:[%s1549_s4 + $0x78] sm:%s1035_s27] }
  0x89   : > { %176 = vst [vmem:[%s1553_s7 + $0x40] sm:%s1035_s27] %v175_v8  ;;  %178 = vst [vmem:[%s1553_s7 + $0x50] sm:%s1035_s27] %v177_v9 }
  0x8a   : > { %v179_v10 = vld [vmem:[%s1549_s4 + $0x90] sm:%s1035_s27]  ;;  %v181_v11 = vld [vmem:[%s1549_s4 + $0xa8] sm:%s1035_s27] }
  0x8b   : > { %180 = vst [vmem:[%s1553_s7 + $0x60] sm:%s1035_s27] %v179_v10  ;;  %182 = vst [vmem:[%s1553_s7 + $0x70] sm:%s1035_s27] %v181_v11 }
  0x8c PF: > { %p1036_p3 = scmp.ge.s32.totalorder %s1402_s15, 1  ;;  %p606_p4 = scmp.lt.s32.totalorder %s1402_s15, 3 }
  0x8e   : > { %p607_p5 = pnand %p1036_p3, %p606_p4 }
  0x8f   : > { %s1860_s20 = sand.u32 (!%p607_p5), 1, %s1394_s13  }
  0x90   : > { %610 = sbr.rel (%p607_p5) target bundleno = 599 (0x257), region = 94  ;;  %s1037_s17 = sshll.u32 (!%p607_p5), %s1860_s20, 7 }
  0x91   : > { %s1877_s24 = scalar_lea.vmem (!%p607_p5), [#allocation2], %s1037_s17  ;;  %s1038_s7 = sshll.u32 (!%p607_p5), %s1860_s20, 2 }
  0x92   : > { %s635_s17 = scalar_lea.vmem (!%p607_p5), [#allocation3], %s1038_s7  ;;  %s837_s26 = scalar_lea.sflag (!%p607_p5), [#allocation4], %s1860_s20 }
  0x95   : > { %v662_v12 = vld [vmem:[%s1997_s0 + $0x78] sm:$0xff]  ;;  %v1470_v13 = vmov 0.0   ;;  %v661_v14 = vld [vmem:[%s1997_s0 + $0x70] sm:$0xff]  ;;  %vm1471_vm0 = vmmov 0   ;;  %v660_v15 = vld [vmem:[%s1997_s0 + $0x68] sm:$0xff]  ;;  %vm749_vm1 = vcmask 523264  }
  0x96   : > { %1073 = vmatprep.subr.mxu0 %v1470_v13  ;;  %1105 = vmatprep.mubr.msk.f32.mxu0 %vm1471_vm0, %v1470_v13  ;;  %v659_v16 = vld [vmem:[%s1997_s0 + $0x60] sm:$0xff]  ;;  %v748_v17 = vld [vmem:[%s1877_s24 + $0x78] sm:$0xff]  ;;  %v747_v18 = vld [vmem:[%s1877_s24 + $0x70] sm:$0xff]  ;;  %s1042_s29 = sshll.u32 (%p1532_p6), %s1514_s16, 1 }
  0x97   : > { %1074 = vmatpush3.msra.mxu0 %v662_v12  ;;  %817 = vmatprep.mubr.f32.mxu1 %v1470_v13  ;;  %v746_v19 = vld [vmem:[%s1877_s24 + $0x68] sm:$0xff]  ;;  %v745_v20 = vld [vmem:[%s1877_s24 + $0x60] sm:$0xff]  ;;  %v658_v21 = vld [vmem:[%s1997_s0 + $0x58] sm:$0xff]  ;;  %s845_s30 = ssub.s32 (%p1532_p6), 3, %s1042_s29 }
  0x98   : > { %1075 = vmatprep.subr.mxu0 %v1470_v13  ;;  %769 = vmatprep.subr.mxu1 %v748_v17  ;;  %v744_v22 = vld [vmem:[%s1877_s24 + $0x58] sm:$0xff]  ;;  %v743_v23 = vld [vmem:[%s1877_s24 + $0x50] sm:$0xff]  ;;  %v742_v25 = vld [vmem:[%s1877_s24 + $0x48] sm:$0xff]  ;;  %p846_p7 = scmp.lt.s32.totalorder (%p1532_p6), %s845_s30, 2 }
  0x99   : > { %1076 = vmatpush3.msra.mxu0 %v661_v14  ;;  %770 = vmatpush1.msra.mxu1 %v747_v18  ;;  %v657_v24 = vld [vmem:[%s1997_s0 + $0x50] sm:$0xff]  ;;  %v741_v26 = vld [vmem:[%s1877_s24 + $0x40] sm:$0xff]  ;;  %v656_v27 = vld [vmem:[%s1997_s0 + $0x48] sm:$0xff] }
  0x9a   : > { %1077 = vmatprep.subr.mxu0 %v1470_v13  ;;  %771 = vmatprep.subr.mxu1 %v746_v19  ;;  %v740_v28 = vld [vmem:[%s1877_s24 + $0x38] sm:$0xff]  ;;  %v739_v29 = vld [vmem:[%s1877_s24 + $0x30] sm:$0xff]  ;;  %v655_v30 = vld [vmem:[%s1997_s0 + $0x40] sm:$0xff] }
  0x9b   : > { %1078 = vmatpush3.msra.mxu0 %v660_v15  ;;  %772 = vmatpush1.msra.mxu1 %v745_v20  ;;  %v738_v31 = vld [vmem:[%s1877_s24 + $0x28] sm:$0xff]  ;;  %v737_v32 = vld [vmem:[%s1877_s24 + $0x20] sm:$0xff]  ;;  %v654_v33 = vld [vmem:[%s1997_s0 + $0x38] sm:$0xff] }
  0x9c   : > { %1079 = vmatprep.subr.mxu0 %v1470_v13  ;;  %773 = vmatprep.subr.mxu1 %v744_v22  ;;  %v736_v34 = vld [vmem:[%s1877_s24 + $0x18] sm:$0xff]  ;;  %v735_v35 = vld [vmem:[%s1877_s24 + $0x10] sm:$0xff]  ;;  %v734_v37 = vld [vmem:[%s1877_s24 + $0x8] sm:$0xff] }
  0x9d   : > { %1080 = vmatpush3.msra.mxu0 %v659_v16  ;;  %774 = vmatpush1.msra.mxu1 %v743_v23  ;;  %v653_v36 = vld [vmem:[%s1997_s0 + $0x30] sm:$0xff]  ;;  %v652_v38 = vld [vmem:[%s1997_s0 + $0x28] sm:$0xff]  ;;  %v651_v39 = vld [vmem:[%s1997_s0 + $0x20] sm:$0xff] }
  0x9e   : > { %1081 = vmatprep.subr.mxu0 %v1470_v13  ;;  %775 = vmatprep.subr.mxu1 %v742_v25  ;;  %v650_v40 = vld [vmem:[%s1997_s0 + $0x18] sm:$0xff]  ;;  %v649_v41 = vld [vmem:[%s1997_s0 + $0x10] sm:$0xff]  ;;  %v648_v42 = vld [vmem:[%s1997_s0 + $0x8] sm:$0xff] }
  0x9f   : > { %1082 = vmatpush3.msra.mxu0 %v658_v21  ;;  %776 = vmatpush1.msra.mxu1 %v741_v26  ;;  %v647_v43 = vld [vmem:[%s1997_s0] sm:$0xff] }
  0xa0   : > { %1083 = vmatprep.subr.mxu0 %v1470_v13  ;;  %777 = vmatprep.subr.mxu1 %v740_v28  ;;  %v646_v44 = vld [vmem:[%s1998_s1] sm:$0x3] }
  0xa1   : > { %1084 = vmatpush3.msra.mxu0 %v657_v24  ;;  %778 = vmatpush1.msra.mxu1 %v739_v29  ;;  %v733_v45 = vld [vmem:[%s1877_s24] sm:$0xff] }
  0xa2   : > { %1085 = vmatprep.subr.mxu0 %v1470_v13  ;;  %779 = vmatprep.subr.mxu1 %v738_v31 }
  0xa3   : > { %1086 = vmatpush3.msra.mxu0 %v656_v27  ;;  %780 = vmatpush1.msra.mxu1 %v737_v32 }
  0xa4   : > { %1087 = vmatprep.subr.mxu0 %v1470_v13  ;;  %781 = vmatprep.subr.mxu1 %v736_v34 }
  0xa5   : > { %1088 = vmatpush3.msra.mxu0 %v655_v30  ;;  %782 = vmatpush1.msra.mxu1 %v735_v35 }
  0xa6   : > { %1089 = vmatprep.subr.mxu0 %v1470_v13  ;;  %783 = vmatprep.subr.mxu1 %v734_v37 }
  0xa7   : > { %1090 = vmatpush3.msra.mxu0 %v654_v33  ;;  %784 = vmatpush1.msra.mxu1 %v733_v45 }
  0xa8   : > { %1091 = vmatprep.subr.mxu0 %v1470_v13 }
  0xa9   : > { %1092 = vmatpush3.msra.mxu0 %v653_v36 }
  0xaa   : > { %1093 = vmatprep.subr.mxu0 %v1470_v13 }
  0xab   : > { %1094 = vmatpush3.msra.mxu0 %v652_v38 }
  0xac   : > { %1095 = vmatprep.subr.mxu0 %v1470_v13 }
  0xad   : > { %1096 = vmatpush3.msra.mxu0 %v651_v39 }
  0xae   : > { %1097 = vmatprep.subr.mxu0 %v1470_v13 }
  0xaf   : > { %1098 = vmatpush3.msra.mxu0 %v650_v40 }
  0xb0   : > { %1099 = vmatprep.subr.mxu0 %v1470_v13 }
  0xb1   : > { %1100 = vmatpush3.msra.mxu0 %v649_v41 }
  0xb2   : > { %1101 = vmatprep.subr.mxu0 %v1470_v13 }
  0xb3   : > { %1102 = vmatpush3.msra.mxu0 %v648_v42 }
  0xb4   : > { %1103 = vmatprep.subr.mxu0 %v1470_v13 }
  0xb5   : > { %1104 = vmatpush3.msra.mxu0 %v647_v43 }
  0xb6   : > { %1106 = vmatmul.mubr.f32.vlgmr.msra.gmra.mxu0 %v646_v44 }
 0x176   : > { %v729_v46 = vpop.f32.mrf.mxu0 }
 0x177   : > { %1039 = vmatmul.mubr.msk.f32.vlgmr.msra.gmra.mxu1 %vm749_vm1, %v729_v46 }
 0x178   : > { %v1107_v47 = vpop.f32.mrf.mxu0 }
 0x237   : > { %v819_v48 = vpop.f32.mrf.mxu1 }
 0x238   : > { %843 = sbr.rel (!%p1532_p6) target bundleno = 599 (0x257), region = 102 }
 0x239   : > { %v821_v49 = vpop.f32.mrf.mxu1 }
 0x23a   : > { %v826_v50 = vcombine.low %v819_v48, %v821_v49 }
 0x23c   : > { %1040 = vst.sshfl [vmem:[%s635_s17] sm:$0x33 pattern:$0x76325410] %v826_v50 }
 0x23d   : > { %s2030_s30 = smov (!%p846_p7, %s845_s30), 2 }
 0x23e   : > { %s1952_s24 = sshll.u32 %s2030_s30, 5 }
 0x23f   : > { %s850_s5 = ssub.s32 64, %s1952_s24 }
 0x240   : > { %851 = vsyncadd %s837_s26, %s850_s5  ;;  %p1044_p10 = scmp.ne.s32.totalorder %s1952_s24, 0  ;;  %s1055_s28 = sshll.u32 %s1514_s16, 6 }
 0x241   : > { %s854_s9 = scalar_lea.hbm %s2000_s3, %s1055_s28  ;;  %s857_s10 = sshll.u32 %s635_s17, 4  ;;  %s858_s10 = int_to_ptr.vmem [resolvable:$true] %s857_s10 }
 0x242   : > { %s1278_s8 = scalar_lea.vmem %s858_s10, %s1952_s24  ;;  %s1472_s25 = smov [#allocation3]  }
 0x243   : > { %p1279_p6 = scmp.ne.s32.totalorder %s858_s10, %s1278_s8  ;;  %s1282_s27 = sshll.u32 %s1472_s25, 4  ;;  %s1283_s27 = int_to_ptr.vmem [resolvable:$false] %s1282_s27 }
 0x244   : > { %s1284_s6 = scalar_lea.vmem %s1283_s27, 128  ;;  %p1285_p13 = scmp.lt.s32.totalorder %s858_s10, %s1283_s27 }
 0x245   : > { %p1280_p11 = pnand %p1279_p6, %p1044_p10  ;;  %p1286_p0 = scmp.lt.s32.totalorder %s1284_s6, %s1278_s8 }
 0x247   : > { %p1281_p12 = pneg %p1280_p11  ;;  %p1287_p1 = por %p1286_p0, %p1285_p13 }
 0x249   : > { %p1288_p2 = pnand %p1287_p1, %p1281_p12 }
 0x24b   : > { %1291 = shalt.err (!%p1288_p2)
}
 0x24c   : > { %s1292_s16 = scalar_lea.hbm %s854_s9, %s1952_s24  ;;  %s1296_s7 = scalar_lea.hbm %s2000_s3, 96 }
 0x24d   : > { %p1293_p3 = scmp.ne.s32.totalorder %s854_s9, %s1292_s16  ;;  %p1297_p7 = scmp.lt.s32.totalorder %s854_s9, %s2000_s3 }
 0x24e   : > { %p1298_p6 = scmp.lt.s32.totalorder %s1296_s7, %s1292_s16 }
 0x24f   : > { %p1294_p4 = pnand %p1293_p3, %p1044_p10 }
 0x250   : > { %p1299_p11 = por %p1298_p6, %p1297_p7 }
 0x251   : > { %p1295_p5 = pneg %p1294_p4 }
 0x253   : > { %p1300_p13 = pnand %p1299_p11, %p1295_p5 }
 0x255   : > { %1303 = shalt.err (!%p1300_p13)
}
 0x256   : > { %860 = dma.vmem_to_hbm [thread:$0]  (%p1044_p10), %s858_s10, %s1952_s24, %s854_s9, %s837_s26  }
 0x257 PF: > { %s869_s30 = sand.u32 1, %s1390_s12   ;;  %p1110_p12 = pnand %p1006_p9, %p1536_p8 }
 0x258   : > { %s870_s5 = scalar_lea.sflag [#allocation4], %s869_s30 }
 0x259   : > { %p1111_p0 = pneg %p1110_p12 }
 0x25b   : > { %1385 = dma.done.wait (%p1111_p0), %s870_s5, 64  }
 0x25c   : > { %1387 = vsyncadd (%p1111_p0), %s870_s5, 4294967232  ;;  %p13_p1 = scmp.ge.s32.totalorder %s1518_s18, 4   ;;  %s2015_s12 = smov %s1394_s13 }
 0x25d   : > { %s2016_s13 = smov %s1398_s14  ;;  %s2017_s14 = smov %s1530_s21 }
 0x25e   : > { %s2018_s15 = smov %s1518_s18  ;;  %15 = sbr.rel (!%p13_p1) target bundleno = 3 (0x3), region = 200 }
 0x263   :  { %875 = vsyncpa [#allocation4], 1 }
 0x264   :  { %877 = vsyncpa [#allocation4 + $0x1], 1 }

</bundles_post_ra>
